<compile_context>
chip_gen: v7x
topology: tpu7x:2x2x1
jax: 0.10.0
libtpu: 0.0.40
codegen_flags: <defaults>
</compile_context>

<pallas_src>
import math
import functools

import jax
import jax.numpy as jnp
from jax.experimental import pallas as pl
from jax.experimental.pallas import tpu as pltpu


def _encoder_layer_kernel(
    x_full_ref, x_q_ref,
    wq_ref, bq_ref, wkv_ref, bkv_ref, wo_ref, bo_ref,
    w1_ref, b1_ref, w2_ref, b2_ref,
    g1_ref, be1_ref, g2_ref, be2_ref,
    o_ref,
    *, d_model, num_heads, compute_dtype, approx_softmax):
    """One (batch, query-tile) grid step of a pre-norm encoder layer."""
    D = d_model
    H = num_heads
    hd = D // H
    scale = 1.0 / math.sqrt(hd)
    eps = 1e-5                       # PyTorch LayerNorm default
    cdt = compute_dtype

    x_full = x_full_ref[0].astype(jnp.float32)   # (S,  D)  keys / values source
    x_q = x_q_ref[0].astype(jnp.float32)         # (Tq, D)  queries / residual

    def layernorm(v, g_ref, b_ref):
        mu = jnp.mean(v, axis=-1, keepdims=True)
        var = jnp.mean((v - mu) ** 2, axis=-1, keepdims=True)
        return (v - mu) * jax.lax.rsqrt(var + eps) * g_ref[0] + b_ref[0]

    # ---- self-attention block (pre-norm) ----
    xn_q = layernorm(x_q, g1_ref, be1_ref)
    xn_f = layernorm(x_full, g1_ref, be1_ref)

    q = jnp.dot(xn_q.astype(cdt), wq_ref[...],
                preferred_element_type=jnp.float32) + bq_ref[0]          # (Tq, D)
    kv = jnp.dot(xn_f.astype(cdt), wkv_ref[...],
                 preferred_element_type=jnp.float32) + bkv_ref[0]        # (S, 2D)
    q = q * scale
    k = kv[:, :D]
    v = kv[:, D:]

    # Head-batched attention: one contraction per QK^T and PV over all heads.
    q3 = jnp.stack([q[:, h * hd:(h + 1) * hd] for h in range(H)], axis=0).astype(cdt)  # (H,Tq,hd)
    k3 = jnp.stack([k[:, h * hd:(h + 1) * hd] for h in range(H)], axis=0).astype(cdt)  # (H,S, hd)
    v3 = jnp.stack([v[:, h * hd:(h + 1) * hd] for h in range(H)], axis=0).astype(cdt)  # (H,S, hd)

    s = jnp.einsum("hqd,hkd->hqk", q3, k3,
                   preferred_element_type=jnp.float32)                   # (H, Tq, S)
    s = s - jnp.max(s, axis=-1, keepdims=True)
    p = jnp.exp(s)
    inv_denom = pl.reciprocal(jnp.sum(p, axis=-1, keepdims=True), approx=approx_softmax)
    p = p * inv_denom

    o3 = jnp.einsum("hqk,hkd->hqd", p.astype(cdt), v3,
                    preferred_element_type=jnp.float32)                  # (H, Tq, hd)
    attn = jnp.concatenate([o3[h] for h in range(H)], axis=-1)           # (Tq, D)
    attn = jnp.dot(attn.astype(cdt), wo_ref[...],
                   preferred_element_type=jnp.float32) + bo_ref[0]
    x = x_q + attn                    # dropout1 = identity (eval)

    # ---- feed-forward block (pre-norm) ----
    xn2 = layernorm(x, g2_ref, be2_ref)
    h1 = jnp.dot(xn2.astype(cdt), w1_ref[...],
                 preferred_element_type=jnp.float32) + b1_ref[0]
    h1 = jnp.maximum(h1, 0.0)         # relu; inner dropout = identity (eval)
    h2 = jnp.dot(h1.astype(cdt), w2_ref[...],
                 preferred_element_type=jnp.float32) + b2_ref[0]
    x = x + h2                        # dropout2 = identity (eval)

    o_ref[0] = x.astype(o_ref.dtype)


def transformer_encoder_layer_bsd(x_bsd, params, *, d_model, num_heads,
                                  block_q=None, compute_dtype=jnp.float32,
                                  approx_softmax=False):
    """Batch-first entry point: x_bsd is (B, S, D). No HBM transposes."""
    B, S, D = x_bsd.shape
    assert D == d_model and D % num_heads == 0
    dim_ff = params["w1"].shape[0]

    if block_q is None:
        block_q = S if S <= 128 else 128
    assert S % block_q == 0
    assert block_q == S or block_q % 8 == 0
    n_q = S // block_q

    f32 = jnp.float32
    cdt = compute_dtype

    # Host-side weight prep: pre-transposed (optionally low-precision) matmul operands.
    w_in = params["w_in"].astype(f32)            # (3D, D) torch layout
    wqT = w_in[:D].T.astype(cdt)                 # (D, D)
    wkvT = w_in[D:].T.astype(cdt)                # (D, 2D)
    bq = params["b_in"][:D].reshape(1, D).astype(f32)
    bkv = params["b_in"][D:].reshape(1, 2 * D).astype(f32)
    woT = params["w_out"].T.astype(cdt)          # (D, D)
    bo = params["b_out"].reshape(1, D).astype(f32)
    w1T = params["w1"].T.astype(cdt)             # (D, F)
    b1 = params["b1"].reshape(1, dim_ff).astype(f32)
    w2T = params["w2"].T.astype(cdt)             # (F, D)
    b2 = params["b2"].reshape(1, D).astype(f32)
    g1 = params["g1"].reshape(1, D).astype(f32)
    be1 = params["be1"].reshape(1, D).astype(f32)
    g2 = params["g2"].reshape(1, D).astype(f32)
    be2 = params["be2"].reshape(1, D).astype(f32)

    consts = [wqT, bq, wkvT, bkv, woT, bo, w1T, b1, w2T, b2, g1, be1, g2, be2]

    def const_spec(a):
        return pl.BlockSpec(a.shape, lambda b, qt: (0, 0))

    # Scoped-VMEM limit sized to the resident working set (weights + activation slabs),
    # clamped to stay valid on every generation (v5e/v6e/v7x).
    weight_bytes = sum(int(a.size) * a.dtype.itemsize for a in consts)
    act_bytes = 4 * (S * D + 3 * block_q * D + S * 2 * D
                     + num_heads * block_q * S + block_q * dim_ff)
    vmem_limit = int(min(max(2 * (weight_bytes + act_bytes), 32 * 1024 * 1024),
                         64 * 1024 * 1024))

    kernel = functools.partial(_encoder_layer_kernel,
                               d_model=D, num_heads=num_heads,
                               compute_dtype=cdt, approx_softmax=approx_softmax)

    return pl.pallas_call(
        kernel,
        out_shape=jax.ShapeDtypeStruct((B, S, D), x_bsd.dtype),
        grid_spec=pltpu.PrefetchScalarGridSpec(
            num_scalar_prefetch=0,
            grid=(B, n_q),
            in_specs=[
                pl.BlockSpec((1, S, D), lambda b, qt: (b, 0, 0)),         # full seq (K/V source)
                pl.BlockSpec((1, block_q, D), lambda b, qt: (b, qt, 0)),  # query tile / residual
            ] + [const_spec(a) for a in consts],
            out_specs=pl.BlockSpec((1, block_q, D), lambda b, qt: (b, qt, 0)),
        ),
        compiler_params=pltpu.CompilerParams(
            dimension_semantics=("parallel", "parallel"),
            vmem_limit_bytes=vmem_limit),
    )(x_bsd, x_bsd, *consts)


def transformer_encoder_layer(src, params, *, d_model, num_heads, **kw):
    """src: (S, B, D) -- PyTorch nn.MultiheadAttention default layout.
    Callers with batch-first data should use transformer_encoder_layer_bsd directly
    and skip these two HBM transposes."""
    x_bsd = jnp.transpose(src, (1, 0, 2))
    out = transformer_encoder_layer_bsd(x_bsd, params, d_model=d_model,
                                        num_heads=num_heads, **kw)
    return jnp.transpose(out, (1, 0, 2))


def _reference(src, params, *, d_model, num_heads):
    """Plain-JAX reference mirroring the PyTorch forward (pre-norm, eval, no masks)."""
    eps = 1e-5
    hd = d_model // num_heads

    def ln(v, g, b):
        mu = jnp.mean(v, -1, keepdims=True)
        var = jnp.mean((v - mu) ** 2, -1, keepdims=True)
        return (v - mu) / jnp.sqrt(var + eps) * g + b

    S, B, D = src.shape
    x = src
    xn = ln(x, params["g1"], params["be1"])
    qkv = xn @ params["w_in"].T + params["b_in"]           # (S, B, 3D)
    q, k, v = jnp.split(qkv, 3, axis=-1)

    def heads(t):  # (S, B, D) -> (B, H, S, hd)
        return jnp.transpose(t.reshape(S, B, num_heads, hd), (1, 2, 0, 3))

    qh = heads(q) * (1.0 / math.sqrt(hd))
    kh, vh = heads(k), heads(v)
    s = jnp.einsum("bhqd,bhkd->bhqk", qh, kh)
    p = jax.nn.softmax(s, axis=-1)
    o = jnp.einsum("bhqk,bhkd->bhqd", p, vh)               # (B, H, S, hd)
    o = jnp.transpose(o, (2, 0, 1, 3)).reshape(S, B, D)
    attn = o @ params["w_out"].T + params["b_out"]
    x = x + attn
    xn = ln(x, params["g2"], params["be2"])
    h = jnp.maximum(xn @ params["w1"].T + params["b1"], 0.0)
    h = h @ params["w2"].T + params["b2"]
    return x + h


def _init_params(key, d_model, num_heads, dim_ff):
    ks = jax.random.split(key, 8)

    def u(k, shape, fan_in):
        bound = 1.0 / math.sqrt(fan_in)
        return jax.random.uniform(k, shape, jnp.float32, -bound, bound)

    return {
        "w_in": u(ks[0], (3 * d_model, d_model), d_model),
        "b_in": u(ks[1], (3 * d_model,), d_model),
        "w_out": u(ks[2], (d_model, d_model), d_model),
        "b_out": u(ks[3], (d_model,), d_model),
        "w1": u(ks[4], (dim_ff, d_model), d_model),
        "b1": u(ks[5], (dim_ff,), d_model),
        "w2": u(ks[6], (d_model, dim_ff), dim_ff),
        "b2": u(ks[7], (d_model,), dim_ff),
        "g1": jnp.ones((d_model,), jnp.float32),
        "be1": jnp.zeros((d_model,), jnp.float32),
        "g2": jnp.ones((d_model,), jnp.float32),
        "be2": jnp.zeros((d_model,), jnp.float32),
    }


if __name__ == "__main__":
    d_model, num_heads, dim_ff = 32, 4, 64
    S, B = 8, 2

    key = jax.random.PRNGKey(0)
    k_x, k_p = jax.random.split(key)
    src = jax.random.normal(k_x, (S, B, d_model), jnp.float32)
    params = _init_params(k_p, d_model, num_heads, dim_ff)

    ref = _reference(src, params, d_model=d_model, num_heads=num_heads)

    # Exact-precision path: f32 matmuls, exact softmax reciprocal.
    out = transformer_encoder_layer(src, params, d_model=d_model, num_heads=num_heads)
    out = jax.block_until_ready(out)
    assert out.shape == (S, B, d_model)
    assert jnp.allclose(out, ref, atol=2e-4, rtol=2e-4), float(jnp.max(jnp.abs(out - ref)))

    # Fast path: bf16 MXU matmuls (f32 accumulation) + EUP approximate reciprocal in softmax.
    out_fast = transformer_encoder_layer(
        src, params, d_model=d_model, num_heads=num_heads,
        compute_dtype=jnp.bfloat16, approx_softmax=True)
    out_fast = jax.block_until_ready(out_fast)
    assert out_fast.shape == (S, B, d_model)
    assert float(jnp.max(jnp.abs(out_fast - ref))) < 0.1

    print("KERNEL_OK")
</pallas_src>

<mosaic_0001>
module attributes {stable_mosaic.version = 11 : i64} {
  func.func @_encoder_layer_kernel(%arg0: i32, %arg1: i32, %arg2: memref<1x8x32xf32, #tpu.memory_space<vmem>>, %arg3: memref<1x8x32xf32, #tpu.memory_space<vmem>>, %arg4: memref<32x32xf32, #tpu.memory_space<vmem>>, %arg5: memref<1x32xf32, #tpu.memory_space<vmem>>, %arg6: memref<32x64xf32, #tpu.memory_space<vmem>>, %arg7: memref<1x64xf32, #tpu.memory_space<vmem>>, %arg8: memref<32x32xf32, #tpu.memory_space<vmem>>, %arg9: memref<1x32xf32, #tpu.memory_space<vmem>>, %arg10: memref<32x64xf32, #tpu.memory_space<vmem>>, %arg11: memref<1x64xf32, #tpu.memory_space<vmem>>, %arg12: memref<64x32xf32, #tpu.memory_space<vmem>>, %arg13: memref<1x32xf32, #tpu.memory_space<vmem>>, %arg14: memref<1x32xf32, #tpu.memory_space<vmem>>, %arg15: memref<1x32xf32, #tpu.memory_space<vmem>>, %arg16: memref<1x32xf32, #tpu.memory_space<vmem>>, %arg17: memref<1x32xf32, #tpu.memory_space<vmem>>, %arg18: memref<1x8x32xf32, #tpu.memory_space<vmem>>) attributes {dimension_semantics = [#tpu.dimension_semantics<parallel>, #tpu.dimension_semantics<parallel>], iteration_bounds = array<i64: 2, 1>, scalar_prefetch = 0 : i64, scratch_operands = 0 : i64, tpu.core_type = #tpu.core_type<tc>, window_params = [{transform_indices = @transform_0, window_bounds = array<i64: 1, 8, 32>}, {transform_indices = @transform_1, window_bounds = array<i64: 1, 8, 32>}, {pipeline_mode = #tpu.pipeline_mode<synchronous>, transform_indices = @transform_2, window_bounds = array<i64: 32, 32>}, {pipeline_mode = #tpu.pipeline_mode<synchronous>, transform_indices = @transform_3, window_bounds = array<i64: 1, 32>}, {pipeline_mode = #tpu.pipeline_mode<synchronous>, transform_indices = @transform_4, window_bounds = array<i64: 32, 64>}, {pipeline_mode = #tpu.pipeline_mode<synchronous>, transform_indices = @transform_5, window_bounds = array<i64: 1, 64>}, {pipeline_mode = #tpu.pipeline_mode<synchronous>, transform_indices = @transform_6, window_bounds = array<i64: 32, 32>}, {pipeline_mode = #tpu.pipeline_mode<synchronous>, transform_indices = @transform_7, window_bounds = array<i64: 1, 32>}, {pipeline_mode = #tpu.pipeline_mode<synchronous>, transform_indices = @transform_8, window_bounds = array<i64: 32, 64>}, {pipeline_mode = #tpu.pipeline_mode<synchronous>, transform_indices = @transform_9, window_bounds = array<i64: 1, 64>}, {pipeline_mode = #tpu.pipeline_mode<synchronous>, transform_indices = @transform_10, window_bounds = array<i64: 64, 32>}, {pipeline_mode = #tpu.pipeline_mode<synchronous>, transform_indices = @transform_11, window_bounds = array<i64: 1, 32>}, {pipeline_mode = #tpu.pipeline_mode<synchronous>, transform_indices = @transform_12, window_bounds = array<i64: 1, 32>}, {pipeline_mode = #tpu.pipeline_mode<synchronous>, transform_indices = @transform_13, window_bounds = array<i64: 1, 32>}, {pipeline_mode = #tpu.pipeline_mode<synchronous>, transform_indices = @transform_14, window_bounds = array<i64: 1, 32>}, {pipeline_mode = #tpu.pipeline_mode<synchronous>, transform_indices = @transform_15, window_bounds = array<i64: 1, 32>}, {transform_indices = @transform_16, window_bounds = array<i64: 1, 8, 32>}]} {
    %c0 = arith.constant 0 : index
    %c0_0 = arith.constant 0 : index
    %c0_1 = arith.constant 0 : index
    %0 = vector.load %arg2[%c0, %c0_0, %c0_1] : memref<1x8x32xf32, #tpu.memory_space<vmem>>, vector<1x8x32xf32>
    %1 = vector.shape_cast %0 : vector<1x8x32xf32> to vector<8x32xf32>
    %c0_2 = arith.constant 0 : index
    %c0_3 = arith.constant 0 : index
    %c0_4 = arith.constant 0 : index
    %2 = vector.load %arg3[%c0_2, %c0_3, %c0_4] : memref<1x8x32xf32, #tpu.memory_space<vmem>>, vector<1x8x32xf32>
    %3 = vector.shape_cast %2 : vector<1x8x32xf32> to vector<8x32xf32>
    %cst = arith.constant dense<0.000000e+00> : vector<8xf32>
    %4 = vector.multi_reduction <add>, %3, %cst [1] : vector<8x32xf32> to vector<8xf32>
    %5 = vector.shape_cast %4 : vector<8xf32> to vector<8x1xf32>
    %cst_5 = arith.constant 3.200000e+01 : f32
    %6 = vector.broadcast %cst_5 : f32 to vector<8x1xf32>
    %7 = arith.divf %5, %6 : vector<8x1xf32>
    %8 = vector.broadcast %7 : vector<8x1xf32> to vector<8x32xf32>
    %9 = arith.subf %3, %8 : vector<8x32xf32>
    %10 = arith.mulf %9, %9 : vector<8x32xf32>
    %cst_6 = arith.constant dense<0.000000e+00> : vector<8xf32>
    %11 = vector.multi_reduction <add>, %10, %cst_6 [1] : vector<8x32xf32> to vector<8xf32>
    %12 = vector.shape_cast %11 : vector<8xf32> to vector<8x1xf32>
    %cst_7 = arith.constant 3.200000e+01 : f32
    %13 = vector.broadcast %cst_7 : f32 to vector<8x1xf32>
    %14 = arith.divf %12, %13 : vector<8x1xf32>
    %15 = vector.broadcast %7 : vector<8x1xf32> to vector<8x32xf32>
    %16 = arith.subf %3, %15 : vector<8x32xf32>
    %cst_8 = arith.constant 9.99999974E-6 : f32
    %17 = vector.broadcast %cst_8 : f32 to vector<8x1xf32>
    %18 = arith.addf %14, %17 : vector<8x1xf32>
    %19 = math.rsqrt %18 : vector<8x1xf32>
    %20 = vector.broadcast %19 : vector<8x1xf32> to vector<8x32xf32>
    %21 = arith.mulf %16, %20 : vector<8x32xf32>
    %c0_9 = arith.constant 0 : index
    %c0_10 = arith.constant 0 : index
    %22 = vector.load %arg14[%c0_9, %c0_10] : memref<1x32xf32, #tpu.memory_space<vmem>>, vector<1x32xf32>
    %23 = vector.shape_cast %22 : vector<1x32xf32> to vector<32xf32>
    %24 = vector.shape_cast %23 : vector<32xf32> to vector<1x32xf32>
    %25 = vector.broadcast %24 : vector<1x32xf32> to vector<8x32xf32>
    %26 = arith.mulf %21, %25 : vector<8x32xf32>
    %c0_11 = arith.constant 0 : index
    %c0_12 = arith.constant 0 : index
    %27 = vector.load %arg15[%c0_11, %c0_12] : memref<1x32xf32, #tpu.memory_space<vmem>>, vector<1x32xf32>
    %28 = vector.shape_cast %27 : vector<1x32xf32> to vector<32xf32>
    %29 = vector.shape_cast %28 : vector<32xf32> to vector<1x32xf32>
    %30 = vector.broadcast %29 : vector<1x32xf32> to vector<8x32xf32>
    %31 = arith.addf %26, %30 : vector<8x32xf32>
    %cst_13 = arith.constant dense<0.000000e+00> : vector<8xf32>
    %32 = vector.multi_reduction <add>, %1, %cst_13 [1] : vector<8x32xf32> to vector<8xf32>
    %33 = vector.shape_cast %32 : vector<8xf32> to vector<8x1xf32>
    %cst_14 = arith.constant 3.200000e+01 : f32
    %34 = vector.broadcast %cst_14 : f32 to vector<8x1xf32>
    %35 = arith.divf %33, %34 : vector<8x1xf32>
    %36 = vector.broadcast %35 : vector<8x1xf32> to vector<8x32xf32>
    %37 = arith.subf %1, %36 : vector<8x32xf32>
    %38 = arith.mulf %37, %37 : vector<8x32xf32>
    %cst_15 = arith.constant dense<0.000000e+00> : vector<8xf32>
    %39 = vector.multi_reduction <add>, %38, %cst_15 [1] : vector<8x32xf32> to vector<8xf32>
    %40 = vector.shape_cast %39 : vector<8xf32> to vector<8x1xf32>
    %cst_16 = arith.constant 3.200000e+01 : f32
    %41 = vector.broadcast %cst_16 : f32 to vector<8x1xf32>
    %42 = arith.divf %40, %41 : vector<8x1xf32>
    %43 = vector.broadcast %35 : vector<8x1xf32> to vector<8x32xf32>
    %44 = arith.subf %1, %43 : vector<8x32xf32>
    %cst_17 = arith.constant 9.99999974E-6 : f32
    %45 = vector.broadcast %cst_17 : f32 to vector<8x1xf32>
    %46 = arith.addf %42, %45 : vector<8x1xf32>
    %47 = math.rsqrt %46 : vector<8x1xf32>
    %48 = vector.broadcast %47 : vector<8x1xf32> to vector<8x32xf32>
    %49 = arith.mulf %44, %48 : vector<8x32xf32>
    %c0_18 = arith.constant 0 : index
    %c0_19 = arith.constant 0 : index
    %50 = vector.load %arg14[%c0_18, %c0_19] : memref<1x32xf32, #tpu.memory_space<vmem>>, vector<1x32xf32>
    %51 = vector.shape_cast %50 : vector<1x32xf32> to vector<32xf32>
    %52 = vector.shape_cast %51 : vector<32xf32> to vector<1x32xf32>
    %53 = vector.broadcast %52 : vector<1x32xf32> to vector<8x32xf32>
    %54 = arith.mulf %49, %53 : vector<8x32xf32>
    %c0_20 = arith.constant 0 : index
    %c0_21 = arith.constant 0 : index
    %55 = vector.load %arg15[%c0_20, %c0_21] : memref<1x32xf32, #tpu.memory_space<vmem>>, vector<1x32xf32>
    %56 = vector.shape_cast %55 : vector<1x32xf32> to vector<32xf32>
    %57 = vector.shape_cast %56 : vector<32xf32> to vector<1x32xf32>
    %58 = vector.broadcast %57 : vector<1x32xf32> to vector<8x32xf32>
    %59 = arith.addf %54, %58 : vector<8x32xf32>
    %c0_22 = arith.constant 0 : index
    %c0_23 = arith.constant 0 : index
    %60 = vector.load %arg4[%c0_22, %c0_23] : memref<32x32xf32, #tpu.memory_space<vmem>>, vector<32x32xf32>
    %cst_24 = arith.constant dense<0.000000e+00> : vector<8x32xf32>
    %61 = tpu.matmul %31, %60, %cst_24 {dimension_numbers = #tpu.dot_dimension_numbers<[1], [0], [0], [1], [0, 0, 1, 1], [], []>} : vector<8x32xf32>, vector<32x32xf32>, vector<8x32xf32> -> vector<8x32xf32>
    %c0_25 = arith.constant 0 : index
    %c0_26 = arith.constant 0 : index
    %62 = vector.load %arg5[%c0_25, %c0_26] : memref<1x32xf32, #tpu.memory_space<vmem>>, vector<1x32xf32>
    %63 = vector.shape_cast %62 : vector<1x32xf32> to vector<32xf32>
    %64 = vector.shape_cast %63 : vector<32xf32> to vector<1x32xf32>
    %65 = vector.broadcast %64 : vector<1x32xf32> to vector<8x32xf32>
    %66 = arith.addf %61, %65 : vector<8x32xf32>
    %c0_27 = arith.constant 0 : index
    %c0_28 = arith.constant 0 : index
    %67 = vector.load %arg6[%c0_27, %c0_28] : memref<32x64xf32, #tpu.memory_space<vmem>>, vector<32x64xf32>
    %cst_29 = arith.constant dense<0.000000e+00> : vector<8x64xf32>
    %68 = tpu.matmul %59, %67, %cst_29 {dimension_numbers = #tpu.dot_dimension_numbers<[1], [0], [0], [1], [0, 0, 1, 1], [], []>} : vector<8x32xf32>, vector<32x64xf32>, vector<8x64xf32> -> vector<8x64xf32>
    %c0_30 = arith.constant 0 : index
    %c0_31 = arith.constant 0 : index
    %69 = vector.load %arg7[%c0_30, %c0_31] : memref<1x64xf32, #tpu.memory_space<vmem>>, vector<1x64xf32>
    %70 = vector.shape_cast %69 : vector<1x64xf32> to vector<64xf32>
    %71 = vector.shape_cast %70 : vector<64xf32> to vector<1x64xf32>
    %72 = vector.broadcast %71 : vector<1x64xf32> to vector<8x64xf32>
    %73 = arith.addf %68, %72 : vector<8x64xf32>
    %cst_32 = arith.constant 0.353553385 : f32
    %74 = vector.broadcast %cst_32 : f32 to vector<8x32xf32>
    %75 = arith.mulf %66, %74 : vector<8x32xf32>
    %76 = vector.extract_strided_slice %73 {offsets = [0, 0], sizes = [8, 32], strides = [1, 1]} : vector<8x64xf32> to vector<8x32xf32>
    %77 = vector.extract_strided_slice %73 {offsets = [0, 32], sizes = [8, 32], strides = [1, 1]} : vector<8x64xf32> to vector<8x32xf32>
    %78 = vector.extract_strided_slice %75 {offsets = [0, 0], sizes = [8, 8], strides = [1, 1]} : vector<8x32xf32> to vector<8x8xf32>
    %79 = vector.extract_strided_slice %75 {offsets = [0, 8], sizes = [8, 8], strides = [1, 1]} : vector<8x32xf32> to vector<8x8xf32>
    %80 = vector.extract_strided_slice %75 {offsets = [0, 16], sizes = [8, 8], strides = [1, 1]} : vector<8x32xf32> to vector<8x8xf32>
    %81 = vector.extract_strided_slice %75 {offsets = [0, 24], sizes = [8, 8], strides = [1, 1]} : vector<8x32xf32> to vector<8x8xf32>
    %82 = vector.shape_cast %78 : vector<8x8xf32> to vector<1x8x8xf32>
    %83 = vector.shape_cast %79 : vector<8x8xf32> to vector<1x8x8xf32>
    %84 = vector.shape_cast %80 : vector<8x8xf32> to vector<1x8x8xf32>
    %85 = vector.shape_cast %81 : vector<8x8xf32> to vector<1x8x8xf32>
    %86 = tpu.concatenate %82, %83, %84, %85 in 0 : vector<1x8x8xf32>, vector<1x8x8xf32>, vector<1x8x8xf32>, vector<1x8x8xf32> -> vector<4x8x8xf32>
    %87 = vector.extract_strided_slice %76 {offsets = [0, 0], sizes = [8, 8], strides = [1, 1]} : vector<8x32xf32> to vector<8x8xf32>
    %88 = vector.extract_strided_slice %76 {offsets = [0, 8], sizes = [8, 8], strides = [1, 1]} : vector<8x32xf32> to vector<8x8xf32>
    %89 = vector.extract_strided_slice %76 {offsets = [0, 16], sizes = [8, 8], strides = [1, 1]} : vector<8x32xf32> to vector<8x8xf32>
    %90 = vector.extract_strided_slice %76 {offsets = [0, 24], sizes = [8, 8], strides = [1, 1]} : vector<8x32xf32> to vector<8x8xf32>
    %91 = vector.shape_cast %87 : vector<8x8xf32> to vector<1x8x8xf32>
    %92 = vector.shape_cast %88 : vector<8x8xf32> to vector<1x8x8xf32>
    %93 = vector.shape_cast %89 : vector<8x8xf32> to vector<1x8x8xf32>
    %94 = vector.shape_cast %90 : vector<8x8xf32> to vector<1x8x8xf32>
    %95 = tpu.concatenate %91, %92, %93, %94 in 0 : vector<1x8x8xf32>, vector<1x8x8xf32>, vector<1x8x8xf32>, vector<1x8x8xf32> -> vector<4x8x8xf32>
    %96 = vector.extract_strided_slice %77 {offsets = [0, 0], sizes = [8, 8], strides = [1, 1]} : vector<8x32xf32> to vector<8x8xf32>
    %97 = vector.extract_strided_slice %77 {offsets = [0, 8], sizes = [8, 8], strides = [1, 1]} : vector<8x32xf32> to vector<8x8xf32>
    %98 = vector.extract_strided_slice %77 {offsets = [0, 16], sizes = [8, 8], strides = [1, 1]} : vector<8x32xf32> to vector<8x8xf32>
    %99 = vector.extract_strided_slice %77 {offsets = [0, 24], sizes = [8, 8], strides = [1, 1]} : vector<8x32xf32> to vector<8x8xf32>
    %100 = vector.shape_cast %96 : vector<8x8xf32> to vector<1x8x8xf32>
    %101 = vector.shape_cast %97 : vector<8x8xf32> to vector<1x8x8xf32>
    %102 = vector.shape_cast %98 : vector<8x8xf32> to vector<1x8x8xf32>
    %103 = vector.shape_cast %99 : vector<8x8xf32> to vector<1x8x8xf32>
    %104 = tpu.concatenate %100, %101, %102, %103 in 0 : vector<1x8x8xf32>, vector<1x8x8xf32>, vector<1x8x8xf32>, vector<1x8x8xf32> -> vector<4x8x8xf32>
    "tpu.trace_start"() <{level = 10 : i32, message = "hqd,hkd->hqk"}> : () -> ()
    %cst_33 = arith.constant dense<0.000000e+00> : vector<4x8x8xf32>
    %105 = tpu.matmul %86, %95, %cst_33 {dimension_numbers = #tpu.dot_dimension_numbers<[2], [2], [1], [1], [0, 0, 0, 1, 1, 1], [0], [0]>} : vector<4x8x8xf32>, vector<4x8x8xf32>, vector<4x8x8xf32> -> vector<4x8x8xf32>
    "tpu.trace_stop"() : () -> ()
    %cst_34 = arith.constant dense<0xFF800000> : vector<4x8xf32>
    %106 = vector.multi_reduction <maximumf>, %105, %cst_34 [2] : vector<4x8x8xf32> to vector<4x8xf32>
    %107 = vector.shape_cast %106 : vector<4x8xf32> to vector<4x8x1xf32>
    %108 = vector.broadcast %107 : vector<4x8x1xf32> to vector<4x8x8xf32>
    %109 = arith.subf %105, %108 : vector<4x8x8xf32>
    %110 = math.exp %109 : vector<4x8x8xf32>
    %cst_35 = arith.constant dense<0.000000e+00> : vector<4x8xf32>
    %111 = vector.multi_reduction <add>, %110, %cst_35 [2] : vector<4x8x8xf32> to vector<4x8xf32>
    %112 = vector.shape_cast %111 : vector<4x8xf32> to vector<4x8x1xf32>
    %113 = tpu.reciprocal %112 : vector<4x8x1xf32> -> vector<4x8x1xf32>
    %114 = vector.broadcast %113 : vector<4x8x1xf32> to vector<4x8x8xf32>
    %115 = arith.mulf %110, %114 : vector<4x8x8xf32>
    "tpu.trace_start"() <{level = 10 : i32, message = "hqk,hkd->hqd"}> : () -> ()
    %cst_36 = arith.constant dense<0.000000e+00> : vector<4x8x8xf32>
    %116 = tpu.matmul %115, %104, %cst_36 {dimension_numbers = #tpu.dot_dimension_numbers<[2], [1], [1], [2], [0, 0, 0, 1, 1, 2], [0], [0]>} : vector<4x8x8xf32>, vector<4x8x8xf32>, vector<4x8x8xf32> -> vector<4x8x8xf32>
    "tpu.trace_stop"() : () -> ()
    %117 = vector.extract_strided_slice %116 {offsets = [0, 0, 0], sizes = [1, 8, 8], strides = [1, 1, 1]} : vector<4x8x8xf32> to vector<1x8x8xf32>
    %118 = vector.shape_cast %117 : vector<1x8x8xf32> to vector<8x8xf32>
    %119 = vector.extract_strided_slice %116 {offsets = [1, 0, 0], sizes = [1, 8, 8], strides = [1, 1, 1]} : vector<4x8x8xf32> to vector<1x8x8xf32>
    %120 = vector.shape_cast %119 : vector<1x8x8xf32> to vector<8x8xf32>
    %121 = vector.extract_strided_slice %116 {offsets = [2, 0, 0], sizes = [1, 8, 8], strides = [1, 1, 1]} : vector<4x8x8xf32> to vector<1x8x8xf32>
    %122 = vector.shape_cast %121 : vector<1x8x8xf32> to vector<8x8xf32>
    %123 = vector.extract_strided_slice %116 {offsets = [3, 0, 0], sizes = [1, 8, 8], strides = [1, 1, 1]} : vector<4x8x8xf32> to vector<1x8x8xf32>
    %124 = vector.shape_cast %123 : vector<1x8x8xf32> to vector<8x8xf32>
    %125 = tpu.concatenate %118, %120, %122, %124 in 1 : vector<8x8xf32>, vector<8x8xf32>, vector<8x8xf32>, vector<8x8xf32> -> vector<8x32xf32>
    %c0_37 = arith.constant 0 : index
    %c0_38 = arith.constant 0 : index
    %126 = vector.load %arg8[%c0_37, %c0_38] : memref<32x32xf32, #tpu.memory_space<vmem>>, vector<32x32xf32>
    %cst_39 = arith.constant dense<0.000000e+00> : vector<8x32xf32>
    %127 = tpu.matmul %125, %126, %cst_39 {dimension_numbers = #tpu.dot_dimension_numbers<[1], [0], [0], [1], [0, 0, 1, 1], [], []>} : vector<8x32xf32>, vector<32x32xf32>, vector<8x32xf32> -> vector<8x32xf32>
    %c0_40 = arith.constant 0 : index
    %c0_41 = arith.constant 0 : index
    %128 = vector.load %arg9[%c0_40, %c0_41] : memref<1x32xf32, #tpu.memory_space<vmem>>, vector<1x32xf32>
    %129 = vector.shape_cast %128 : vector<1x32xf32> to vector<32xf32>
    %130 = vector.shape_cast %129 : vector<32xf32> to vector<1x32xf32>
    %131 = vector.broadcast %130 : vector<1x32xf32> to vector<8x32xf32>
    %132 = arith.addf %127, %131 : vector<8x32xf32>
    %133 = arith.addf %3, %132 : vector<8x32xf32>
    %cst_42 = arith.constant dense<0.000000e+00> : vector<8xf32>
    %134 = vector.multi_reduction <add>, %133, %cst_42 [1] : vector<8x32xf32> to vector<8xf32>
    %135 = vector.shape_cast %134 : vector<8xf32> to vector<8x1xf32>
    %cst_43 = arith.constant 3.200000e+01 : f32
    %136 = vector.broadcast %cst_43 : f32 to vector<8x1xf32>
    %137 = arith.divf %135, %136 : vector<8x1xf32>
    %138 = vector.broadcast %137 : vector<8x1xf32> to vector<8x32xf32>
    %139 = arith.subf %133, %138 : vector<8x32xf32>
    %140 = arith.mulf %139, %139 : vector<8x32xf32>
    %cst_44 = arith.constant dense<0.000000e+00> : vector<8xf32>
    %141 = vector.multi_reduction <add>, %140, %cst_44 [1] : vector<8x32xf32> to vector<8xf32>
    %142 = vector.shape_cast %141 : vector<8xf32> to vector<8x1xf32>
    %cst_45 = arith.constant 3.200000e+01 : f32
    %143 = vector.broadcast %cst_45 : f32 to vector<8x1xf32>
    %144 = arith.divf %142, %143 : vector<8x1xf32>
    %145 = vector.broadcast %137 : vector<8x1xf32> to vector<8x32xf32>
    %146 = arith.subf %133, %145 : vector<8x32xf32>
    %cst_46 = arith.constant 9.99999974E-6 : f32
    %147 = vector.broadcast %cst_46 : f32 to vector<8x1xf32>
    %148 = arith.addf %144, %147 : vector<8x1xf32>
    %149 = math.rsqrt %148 : vector<8x1xf32>
    %150 = vector.broadcast %149 : vector<8x1xf32> to vector<8x32xf32>
    %151 = arith.mulf %146, %150 : vector<8x32xf32>
    %c0_47 = arith.constant 0 : index
    %c0_48 = arith.constant 0 : index
    %152 = vector.load %arg16[%c0_47, %c0_48] : memref<1x32xf32, #tpu.memory_space<vmem>>, vector<1x32xf32>
    %153 = vector.shape_cast %152 : vector<1x32xf32> to vector<32xf32>
    %154 = vector.shape_cast %153 : vector<32xf32> to vector<1x32xf32>
    %155 = vector.broadcast %154 : vector<1x32xf32> to vector<8x32xf32>
    %156 = arith.mulf %151, %155 : vector<8x32xf32>
    %c0_49 = arith.constant 0 : index
    %c0_50 = arith.constant 0 : index
    %157 = vector.load %arg17[%c0_49, %c0_50] : memref<1x32xf32, #tpu.memory_space<vmem>>, vector<1x32xf32>
    %158 = vector.shape_cast %157 : vector<1x32xf32> to vector<32xf32>
    %159 = vector.shape_cast %158 : vector<32xf32> to vector<1x32xf32>
    %160 = vector.broadcast %159 : vector<1x32xf32> to vector<8x32xf32>
    %161 = arith.addf %156, %160 : vector<8x32xf32>
    %c0_51 = arith.constant 0 : index
    %c0_52 = arith.constant 0 : index
    %162 = vector.load %arg10[%c0_51, %c0_52] : memref<32x64xf32, #tpu.memory_space<vmem>>, vector<32x64xf32>
    %cst_53 = arith.constant dense<0.000000e+00> : vector<8x64xf32>
    %163 = tpu.matmul %161, %162, %cst_53 {dimension_numbers = #tpu.dot_dimension_numbers<[1], [0], [0], [1], [0, 0, 1, 1], [], []>} : vector<8x32xf32>, vector<32x64xf32>, vector<8x64xf32> -> vector<8x64xf32>
    %c0_54 = arith.constant 0 : index
    %c0_55 = arith.constant 0 : index
    %164 = vector.load %arg11[%c0_54, %c0_55] : memref<1x64xf32, #tpu.memory_space<vmem>>, vector<1x64xf32>
    %165 = vector.shape_cast %164 : vector<1x64xf32> to vector<64xf32>
    %166 = vector.shape_cast %165 : vector<64xf32> to vector<1x64xf32>
    %167 = vector.broadcast %166 : vector<1x64xf32> to vector<8x64xf32>
    %168 = arith.addf %163, %167 : vector<8x64xf32>
    %cst_56 = arith.constant 0.000000e+00 : f32
    %169 = vector.broadcast %cst_56 : f32 to vector<8x64xf32>
    %170 = arith.maximumf %168, %169 : vector<8x64xf32>
    %c0_57 = arith.constant 0 : index
    %c0_58 = arith.constant 0 : index
    %171 = vector.load %arg12[%c0_57, %c0_58] : memref<64x32xf32, #tpu.memory_space<vmem>>, vector<64x32xf32>
    %cst_59 = arith.constant dense<0.000000e+00> : vector<8x32xf32>
    %172 = tpu.matmul %170, %171, %cst_59 {dimension_numbers = #tpu.dot_dimension_numbers<[1], [0], [0], [1], [0, 0, 1, 1], [], []>} : vector<8x64xf32>, vector<64x32xf32>, vector<8x32xf32> -> vector<8x32xf32>
    %c0_60 = arith.constant 0 : index
    %c0_61 = arith.constant 0 : index
    %173 = vector.load %arg13[%c0_60, %c0_61] : memref<1x32xf32, #tpu.memory_space<vmem>>, vector<1x32xf32>
    %174 = vector.shape_cast %173 : vector<1x32xf32> to vector<32xf32>
    %175 = vector.shape_cast %174 : vector<32xf32> to vector<1x32xf32>
    %176 = vector.broadcast %175 : vector<1x32xf32> to vector<8x32xf32>
    %177 = arith.addf %172, %176 : vector<8x32xf32>
    %178 = arith.addf %133, %177 : vector<8x32xf32>
    %c0_62 = arith.constant 0 : index
    %c0_63 = arith.constant 0 : index
    %c0_64 = arith.constant 0 : index
    %179 = vector.load %arg18[%c0_62, %c0_63, %c0_64] : memref<1x8x32xf32, #tpu.memory_space<vmem>>, vector<1x8x32xf32>
    %180 = vector.shape_cast %179 : vector<1x8x32xf32> to vector<8x32xf32>
    %181 = vector.shape_cast %178 : vector<8x32xf32> to vector<1x8x32xf32>
    tpu.vector_store %arg18[%c0_62, %c0_63, %c0_64], %181 {strides = array<i32>} : memref<1x8x32xf32, #tpu.memory_space<vmem>>, vector<1x8x32xf32>,
    return
  }
  func.func @transform_0(%arg0: i32, %arg1: i32) -> (i32, i32, i32) {
    %c0_i32 = arith.constant 0 : i32
    %c0_i32_0 = arith.constant 0 : i32
    %c0_i32_1 = arith.constant 0 : i32
    return %arg0, %c0_i32, %c0_i32_0 : i32, i32, i32
  }
  func.func @transform_1(%arg0: i32, %arg1: i32) -> (i32, i32, i32) {
    %c0_i32 = arith.constant 0 : i32
    %c0_i32_0 = arith.constant 0 : i32
    return %arg0, %arg1, %c0_i32 : i32, i32, i32
  }
  func.func @transform_2(%arg0: i32, %arg1: i32) -> (i32, i32) {
    %c0_i32 = arith.constant 0 : i32
    %c0_i32_0 = arith.constant 0 : i32
    %c0_i32_1 = arith.constant 0 : i32
    return %c0_i32, %c0_i32_0 : i32, i32
  }
  func.func @transform_3(%arg0: i32, %arg1: i32) -> (i32, i32) {
    %c0_i32 = arith.constant 0 : i32
    %c0_i32_0 = arith.constant 0 : i32
    %c0_i32_1 = arith.constant 0 : i32
    return %c0_i32, %c0_i32_0 : i32, i32
  }
  func.func @transform_4(%arg0: i32, %arg1: i32) -> (i32, i32) {
    %c0_i32 = arith.constant 0 : i32
    %c0_i32_0 = arith.constant 0 : i32
    %c0_i32_1 = arith.constant 0 : i32
    return %c0_i32, %c0_i32_0 : i32, i32
  }
  func.func @transform_5(%arg0: i32, %arg1: i32) -> (i32, i32) {
    %c0_i32 = arith.constant 0 : i32
    %c0_i32_0 = arith.constant 0 : i32
    %c0_i32_1 = arith.constant 0 : i32
    return %c0_i32, %c0_i32_0 : i32, i32
  }
  func.func @transform_6(%arg0: i32, %arg1: i32) -> (i32, i32) {
    %c0_i32 = arith.constant 0 : i32
    %c0_i32_0 = arith.constant 0 : i32
    %c0_i32_1 = arith.constant 0 : i32
    return %c0_i32, %c0_i32_0 : i32, i32
  }
  func.func @transform_7(%arg0: i32, %arg1: i32) -> (i32, i32) {
    %c0_i32 = arith.constant 0 : i32
    %c0_i32_0 = arith.constant 0 : i32
    %c0_i32_1 = arith.constant 0 : i32
    return %c0_i32, %c0_i32_0 : i32, i32
  }
  func.func @transform_8(%arg0: i32, %arg1: i32) -> (i32, i32) {
    %c0_i32 = arith.constant 0 : i32
    %c0_i32_0 = arith.constant 0 : i32
    %c0_i32_1 = arith.constant 0 : i32
    return %c0_i32, %c0_i32_0 : i32, i32
  }
  func.func @transform_9(%arg0: i32, %arg1: i32) -> (i32, i32) {
    %c0_i32 = arith.constant 0 : i32
    %c0_i32_0 = arith.constant 0 : i32
    %c0_i32_1 = arith.constant 0 : i32
    return %c0_i32, %c0_i32_0 : i32, i32
  }
  func.func @transform_10(%arg0: i32, %arg1: i32) -> (i32, i32) {
    %c0_i32 = arith.constant 0 : i32
    %c0_i32_0 = arith.constant 0 : i32
    %c0_i32_1 = arith.constant 0 : i32
    return %c0_i32, %c0_i32_0 : i32, i32
  }
  func.func @transform_11(%arg0: i32, %arg1: i32) -> (i32, i32) {
    %c0_i32 = arith.constant 0 : i32
    %c0_i32_0 = arith.constant 0 : i32
    %c0_i32_1 = arith.constant 0 : i32
    return %c0_i32, %c0_i32_0 : i32, i32
  }
  func.func @transform_12(%arg0: i32, %arg1: i32) -> (i32, i32) {
    %c0_i32 = arith.constant 0 : i32
    %c0_i32_0 = arith.constant 0 : i32
    %c0_i32_1 = arith.constant 0 : i32
    return %c0_i32, %c0_i32_0 : i32, i32
  }
  func.func @transform_13(%arg0: i32, %arg1: i32) -> (i32, i32) {
    %c0_i32 = arith.constant 0 : i32
    %c0_i32_0 = arith.constant 0 : i32
    %c0_i32_1 = arith.constant 0 : i32
    return %c0_i32, %c0_i32_0 : i32, i32
  }
  func.func @transform_14(%arg0: i32, %arg1: i32) -> (i32, i32) {
    %c0_i32 = arith.constant 0 : i32
    %c0_i32_0 = arith.constant 0 : i32
    %c0_i32_1 = arith.constant 0 : i32
    return %c0_i32, %c0_i32_0 : i32, i32
  }
  func.func @transform_15(%arg0: i32, %arg1: i32) -> (i32, i32) {
    %c0_i32 = arith.constant 0 : i32
    %c0_i32_0 = arith.constant 0 : i32
    %c0_i32_1 = arith.constant 0 : i32
    return %c0_i32, %c0_i32_0 : i32, i32
  }
  func.func @transform_16(%arg0: i32, %arg1: i32) -> (i32, i32, i32) {
    %c0_i32 = arith.constant 0 : i32
    %c0_i32_0 = arith.constant 0 : i32
    return %arg0, %arg1, %c0_i32 : i32, i32, i32
  }
}

</mosaic_0001>

<bundles_post_ra>
// kernel: tpu_custom_call.1
= control target key start
LH: loop header
LB: loop body
LE: loop exit
PB: predicated region body
PF: predicated region fallthrough
CT: control target
= control target key end

     0   :  { %s2964_s0 = inlined_call_operand.hbm [shape: f32[2,8,32], index: 0, kind: input, shape index: {}]   ;;  %s2965_s1 = inlined_call_operand.hbm [shape: f32[2,8,32], index: 1, kind: input, shape index: {}]   ;;  %s2966_s2 = inlined_call_operand.vmem [shape: f32[32,32], index: 2, kind: input, shape index: {}]   ;;  %s2967_s3 = inlined_call_operand.vmem [shape: f32[1,32], index: 3, kind: input, shape index: {}]   ;;  %s2968_s4 = inlined_call_operand.vmem [shape: f32[32,64], index: 4, kind: input, shape index: {}]   ;;  %s2969_s5 = inlined_call_operand.vmem [shape: f32[1,64], index: 5, kind: input, shape index: {}]   ;;  %s2970_s6 = inlined_call_operand.vmem [shape: f32[32,32], index: 6, kind: input, shape index: {}]   ;;  %s2971_s7 = inlined_call_operand.vmem [shape: f32[1,32], index: 7, kind: input, shape index: {}]   ;;  %s2972_s8 = inlined_call_operand.hbm [shape: f32[32,64], index: 8, kind: input, shape index: {}]   ;;  %s2973_s9 = inlined_call_operand.vmem [shape: f32[1,64], index: 9, kind: input, shape index: {}]   ;;  %s2974_s10 = inlined_call_operand.vmem [shape: f32[64,32], index: 10, kind: input, shape index: {}]   ;;  %s2975_s11 = inlined_call_operand.vmem [shape: f32[1,32], index: 11, kind: input, shape index: {}]   ;;  %s2976_s12 = inlined_call_operand.vmem [shape: f32[1,32], index: 12, kind: input, shape index: {}]   ;;  %s2977_s13 = inlined_call_operand.vmem [shape: f32[1,32], index: 13, kind: input, shape index: {}]   ;;  %s2978_s14 = inlined_call_operand.vmem [shape: f32[1,32], index: 14, kind: input, shape index: {}]   ;;  %s2979_s15 = inlined_call_operand.vmem [shape: f32[1,32], index: 15, kind: input, shape index: {}]   ;;  %s2980_s16 = inlined_call_operand.hbm [shape: f32[2,8,32], index: 16, kind: output, shape index: {}]  }
   0x1   :  { %2995 = sst [smem:[#allocation21_spill]] %s2964_s0 }
   0x2   :  { %2996 = sst [smem:[#allocation22_spill]] %s2972_s8 }
   0x3   :  { %2997 = sst [smem:[#allocation23_spill]] %s2973_s9 }
   0x4   :  { %2998 = sst [smem:[#allocation24_spill]] %s2974_s10 }
   0x5   :  { %2999 = sst [smem:[#allocation25_spill]] %s2975_s11 }
   0x6   :  { %3000 = sst [smem:[#allocation26_spill]] %s2978_s14 }
   0x7   :  { %3001 = sst [smem:[#allocation27_spill]] %s2979_s15 }
   0x8   :  { %3002 = sst [smem:[#allocation28_spill]] %s2980_s16 }
   0x9   :  { %21 = vsyncpa [#allocation3], 0 }
   0xa   :  { %23 = vsyncpa [#allocation3 + $0x1], 0 }
   0xb   :  { %24 = vsyncpa [#allocation6], 0 }
   0xc   :  { %26 = vsyncpa [#allocation6 + $0x1], 0 }
   0xd   :  { %27 = vsyncpa [#allocation4], 0 }
   0xe   :  { %29 = vsyncpa [#allocation4 + $0x1], 0  ;;  %s2536_s21 = smov 0   ;;  %s2538_s22 = smov 0  }
   0xf   :  { %s2540_s23 = smov 0   ;;  %s2542_s24 = smov 0  }
  0x10   :  { %s2544_s25 = smov 0   ;;  %s2546_s26 = smov 0  }
  0x11 LB: > { %3003 = sst [smem:[#allocation13_spill]] %s2413_s21  ;;  %s2567_s27 = sadd.s32 4294967295, %s2433_s26   ;;  %s2433_s26 = sphi %s2546_s26, %s35_s26   ;;  %s2429_s25 = sphi %s2544_s25, %s3041_s25   ;;  %s2425_s24 = sphi %s2542_s24, %s3040_s24   ;;  %s2421_s23 = sphi %s2540_s23, %s3044_s23   ;;  %s2417_s22 = sphi %s2538_s22, %s3043_s22   ;;  %s2413_s21 = sphi %s2536_s21, %s3042_s21  }
  0x12   : > { %3004 = sst [smem:[#allocation14_spill]] %s2421_s23  ;;  %s1916_s28 = sadd.s32 4294967294, %s2433_s26  }
  0x13   : > { %3005 = sst [smem:[#allocation15_spill]] %s2425_s24  ;;  %p67_p0 = scmp.ne.s32.totalorder %s2417_s22, %s2413_s21 }
  0x14   : > { %3006 = sst [smem:[#allocation16_spill]] %s2429_s25  ;;  %p2985_p1 = scmp.eq.s32.totalorder %s2567_s27, 0 }
  0x15   : > { %p421_p3 = scmp.eq.s32.totalorder %s1916_s28, 1  ;;  %p1917_p5 = scmp.ge.s32.totalorder %s2433_s26, 1 }
  0x16   : > { %p2576_p4 = por %p2985_p1, %p67_p0  ;;  %p428_p7 = scmp.lt.s32.totalorder %s2433_s26, 3 }
  0x17   : > { %p2581_p6 = por %p421_p3, %p67_p0  ;;  %s2435_s17 = smov [#allocation7]  }
  0x18   : > { %s3007_s29 = scalar_select %p2576_p4, 1, 0 }
  0x19   : > { %s3008_s30 = scalar_select %p2581_p6, 1, 0 }
  0x1a   : > { %p2586_p8 = pnand %p1917_p5, %p428_p7  ;;  %s458_s18 = sshll.u32 %s2435_s17, 4  ;;  %s459_s18 = int_to_ptr.vmem [resolvable:$true] %s458_s18 }
  0x1b   : > { %3009 = sst [smem:[#allocation17_spill]] %s3008_s30  ;;  %s47_s20 = sadd.s32 1, %s2429_s25 }
  0x1c   : > { %s3010_s0 = scalar_select %p2586_p8, 1, 0 }
  0x1d   : > { %p2153_p9 = pneg %p2586_p8  ;;  %s3012_s8 = sld [smem:[#allocation22_spill]] }
  0x1f   : > { %p2595_p11 = pnand %p2153_p9, %p2985_p1 }
  0x21   : > { %p2257_p13 = pneg %p2595_p11 }
  0x23   : > { %s2255_s21 = scalar_lea.hbm %s3012_s8, 512 }
  0x24   : > { %p2256_p12 = scmp.ne.s32.totalorder %s3012_s8, %s2255_s21  ;;  %p2262_p5 = scmp.lt.u32.totalorder %s2255_s21, %s3012_s8 }
  0x26   : > { %p2258_p0 = pnand %p2257_p13, %p2256_p12 }
  0x28   : > { %p2259_p3 = pneg %p2258_p0 }
  0x2a   : > { %p2264_p7 = pnand %p2262_p5, %p2259_p3 }
  0x2c   : > { %2267 = shalt.err (!%p2264_p7)
}
  0x2d   : > { %s2268_s24 = scalar_lea.vmem %s459_s18, 512  ;;  %p2276_p2 = scmp.lt.s32.totalorder %s459_s18, %s459_s18 }
  0x2e   : > { %p2269_p9 = scmp.ne.s32.totalorder %s459_s18, %s2268_s24  ;;  %p2277_p6 = scmp.lt.s32.totalorder %s2268_s24, %s2268_s24 }
  0x30   : > { %p2271_p10 = pnand %p2269_p9, %p2257_p13  ;;  %p2278_p4 = por %p2277_p6, %p2276_p2 }
  0x32   : > { %p2272_p1 = pneg %p2271_p10 }
  0x34   : > { %p2279_p8 = pnand %p2278_p4, %p2272_p1 }
  0x36   : > { %2282 = shalt.err (!%p2279_p8)
}
  0x37   : > { %s2436_s11 = smov 128   ;;  %s2437_s9 = smov 8  }
  0x38   : > { %2156 = dma.hbm_to_vmem [thread:$0]  (!%p2595_p11), %s3012_s8, 512, %s459_s18, [#allocation6], %s2436_s11, %s2436_s11, %s2437_s9  }
  0x39   : > { %p49_p1 = scmp.ge.s32.totalorder %s47_s20, 2  ;;  %s54_s24 = sadd.s32 1, %s2421_s23 }
  0x3a   : > { %p61_p2 = scmp.ne.s32.totalorder %s2421_s23, %s2417_s22  ;;  %p62_p4 = scmp.eq.s32.totalorder %s2433_s26, 0 }
  0x3b   : > { %s3046_s20 = smov (%p49_p1, %s47_s20), 0  ;;  %p3015_p8 = scmp.eq.s32.totalorder %s2567_s27, 1 }
  0x3c   : > { %3013 = sst [smem:[#allocation18_spill]] %s3046_s20  ;;  %p2622_p6 = por %p62_p4, %p61_p2 }
  0x3d   : > { %p2628_p10 = por %p3015_p8, %p61_p2  ;;  %s51_s28 = ssub.s32 %s2429_s25, %s3046_s20 }
  0x3e   : > { %p2169_p11 = scmp.lt.s32.totalorder %s2433_s26, 2  ;;  %p52_p12 = scmp.eq.s32.totalorder %s51_s28, 0 }
  0x3f   : > { %s3016_s19 = scalar_select %p2628_p10, 1, 0 }
  0x40   : > { %s493_s18 = sand.u32 1, %s2421_s23   ;;  %s1921_s9 = sshll.u32 %s2429_s25, 7 }
  0x41   : > { %3017 = sst [smem:[#allocation19_spill]] %s3016_s19  ;;  %s2636_s17 = sshll.u32 %s493_s18, 3 }
  0x42   : > { %s2639_s11 = scalar_select %p52_p12, %s2421_s23, %s54_s24  }
  0x43   : > { %s3019_s8 = sld [smem:[#allocation21_spill]]  ;;  %s497_s14 = scalar_lea.vmem [#allocation2], %s2636_s17 }
  0x44   : > { %3018 = sst [smem:[#allocation20_spill]] %s2639_s11  ;;  %s504_s20 = sshll.u32 %s497_s14, 4  ;;  %s2648_s20 = int_to_ptr.vmem [resolvable:$true] %s504_s20 }
  0x45   : > { %p2652_p13 = pnand %p2169_p11, %p2622_p6  ;;  %s2659_s16 = scalar_lea.hbm %s2965_s1, %s1921_s9 }
  0x46   : > { %s511_s21 = sand.u32 1, %s2433_s26   ;;  %s494_s11 = scalar_lea.sflag [#allocation3], %s493_s18 }
  0x47   : > { %p2285_p3 = pneg %p2652_p13 }
  0x49   : > { %s2645_s15 = scalar_lea.hbm %s3019_s8, %s1921_s9  ;;  %s2288_s19 = scalar_lea.hbm %s3019_s8, 256 }
  0x4a   : > { %s2283_s23 = scalar_lea.hbm %s2645_s15, 128  ;;  %p2289_p9 = scmp.lt.u32.totalorder %s2645_s15, %s3019_s8 }
  0x4b   : > { %p2284_p0 = scmp.ne.s32.totalorder %s2645_s15, %s2283_s23  ;;  %p2290_p1 = scmp.lt.u32.totalorder %s2288_s19, %s2283_s23 }
  0x4c   : > { %p2292_p4 = scmp.lt.u32.totalorder %s2283_s23, %s2645_s15 }
  0x4d   : > { %p2286_p5 = pnand %p2285_p3, %p2284_p0  ;;  %p2291_p2 = por %p2290_p1, %p2289_p9 }
  0x4f   : > { %p2287_p7 = pneg %p2286_p5  ;;  %p2293_p6 = por %p2292_p4, %p2291_p2 }
  0x51   : > { %p2294_p8 = pnand %p2293_p6, %p2287_p7 }
  0x53   : > { %2297 = shalt.err (!%p2294_p8)
}
  0x54   : > { %s2298_s18 = scalar_lea.vmem %s2648_s20, 128  ;;  %s2438_s9 = smov [#allocation2]  }
  0x55   : > { %p2299_p11 = scmp.ne.s32.totalorder %s2648_s20, %s2298_s18  ;;  %s2303_s24 = sshll.u32 %s2438_s9, 4  ;;  %s2304_s24 = int_to_ptr.vmem [resolvable:$false] %s2303_s24 }
  0x56   : > { %s2305_s10 = scalar_lea.vmem %s2304_s24, 256  ;;  %p2306_p5 = scmp.lt.s32.totalorder %s2648_s20, %s2304_s24 }
  0x57   : > { %p2301_p12 = pnand %p2299_p11, %p2285_p3  ;;  %p2307_p9 = scmp.lt.s32.totalorder %s2305_s10, %s2298_s18 }
  0x59   : > { %p2302_p0 = pneg %p2301_p12  ;;  %p2308_p1 = por %p2307_p9, %p2306_p5 }
  0x5b   : > { %p2309_p2 = pnand %p2308_p1, %p2302_p0 }
  0x5d   : > { %2312 = shalt.err (!%p2309_p2)
}
  0x5e   : > { %2160 = dma.hbm_to_vmem [thread:$0]  (!%p2652_p13), %s2645_s15, 128, %s2648_s20, %s494_s11  }
  0x5f   : > { %s515_s23 = scalar_lea.vmem [#allocation5], %s2636_s17  ;;  %s512_s14 = scalar_lea.sflag [#allocation6], %s511_s21 }
  0x60   : > { %s523_s19 = sshll.u32 %s515_s23, 4  ;;  %s2313_s30 = scalar_lea.hbm %s2659_s16, 128  ;;  %s524_s19 = int_to_ptr.vmem [resolvable:$true] %s523_s19 }
  0x61   : > { %p2314_p7 = scmp.ne.s32.totalorder %s2659_s16, %s2313_s30  ;;  %s2318_s9 = scalar_lea.hbm %s2965_s1, 256 }
  0x62   : > { %p2319_p8 = scmp.lt.u32.totalorder %s2659_s16, %s2965_s1  ;;  %p2320_p11 = scmp.lt.u32.totalorder %s2318_s9, %s2313_s30 }
  0x63   : > { %p2316_p4 = pnand %p2314_p7, %p2285_p3  ;;  %p2322_p0 = scmp.lt.u32.totalorder %s2313_s30, %s2659_s16 }
  0x64   : > { %p2321_p12 = por %p2320_p11, %p2319_p8 }
  0x65   : > { %p2317_p6 = pneg %p2316_p4 }
  0x66   : > { %p2323_p5 = por %p2322_p0, %p2321_p12 }
  0x68   : > { %p2324_p9 = pnand %p2323_p5, %p2317_p6 }
  0x6a   : > { %2327 = shalt.err (!%p2324_p9)
}
  0x6b   : > { %s2328_s15 = scalar_lea.vmem %s524_s19, 128  ;;  %s2439_s20 = smov [#allocation5]  }
  0x6c   : > { %p2329_p1 = scmp.ne.s32.totalorder %s524_s19, %s2328_s15  ;;  %s2333_s17 = sshll.u32 %s2439_s20, 4  ;;  %s2334_s17 = int_to_ptr.vmem [resolvable:$false] %s2333_s17 }
  0x6d   : > { %s2335_s11 = scalar_lea.vmem %s2334_s17, 256  ;;  %p2336_p4 = scmp.lt.s32.totalorder %s524_s19, %s2334_s17 }
  0x6e   : > { %p2331_p2 = pnand %p2329_p1, %p2285_p3  ;;  %p2337_p10 = scmp.lt.s32.totalorder %s2335_s11, %s2328_s15 }
  0x70   : > { %p2332_p7 = pneg %p2331_p2  ;;  %p2338_p8 = por %p2337_p10, %p2336_p4 }
  0x72   : > { %p2339_p11 = pnand %p2338_p8, %p2332_p7 }
  0x74   : > { %2342 = shalt.err (!%p2339_p11)
}
  0x75   : > { %2163 = dma.hbm_to_vmem [thread:$0]  (!%p2652_p13), %s2659_s16, 128, %s524_s19, %s512_s14  }
  0x76   : > { %p3021_p6 = scmp.ne.s32.totalorder %s3010_s0, 0 }
  0x77   : > { %s2712_s21 = sand.u32 (!%p3021_p6), 1, %s2417_s22   ;;  %p3022_p10 = scmp.ne.s32.totalorder (!%p3021_p6), %s3007_s29, 0 }
  0x78   : > { %532 = sbr.rel (%p3021_p6) target bundleno = 2674 (0xa72), region = 84  ;;  %s2715_s23 = sshll.u32 (!%p3021_p6), %s2712_s21, 3 }
  0x79   : > { %s535_s30 = scalar_lea.sflag (!%p3021_p6), [#allocation3], %s2712_s21  ;;  %s538_s25 = scalar_lea.vmem (!%p3021_p6), [#allocation2], %s2715_s23 }
  0x7f   : > { %2396 = dma.done.wait (%p3022_p10), %s535_s30, 128  }
  0x80   : > { %2398 = vsyncadd (%p3022_p10), %s535_s30, 4294967168  ;;  %s543_s0 = sand.u32 1, %s2567_s27   ;;  %s547_s16 = scalar_lea.vmem [#allocation5], %s2715_s23 }
  0x81   : > { %s544_s28 = scalar_lea.sflag [#allocation6], %s543_s0 }
  0x82   : > { %2400 = dma.done.wait (%p3022_p10), %s544_s28, 128  }
  0x83   : > { %2402 = vsyncadd (%p3022_p10), %s544_s28, 4294967168  ;;  %p3023_p13 = scmp.eq.s32.totalorder %s2567_s27, 0 }
  0x85   : > { %2404 = dma.done.wait (%p3023_p13), [#allocation6], 512   ;;  %p3024_p3 = pmov %p3023_p13 }
  0x86   : > { %vm607_vm0 = vcmask 261120   ;;  %v2733_v0 = vld [vmem:[%s547_s16] sm:$0xff]  ;;  %v605_v1 = vld [vmem:[%s538_s25] sm:$0xff]  ;;  %v2440_v17 = vmov 0.0|0.0   ;;  %vm2441_vm1 = vmmov 0   ;;  %v2442_v21 = vmov 0.0  }
  0x87   : > { %2406 = vsyncadd (%p3024_p3), [#allocation6], 4294966784  ;;  %v608_v2 = vsel %vm607_vm0, %v2733_v0, 0.0  ;;  %v638_v3 = vsel %vm607_vm0, %v605_v1, 0.0  ;;  %v653_v14 = vld [vmem:[%s2966_s2] sm:$0xff]  ;;  %v654_v15 = vld [vmem:[%s2966_s2 + $0x8] sm:$0xff]  ;;  %2107 = vmatprep.subr.bf16.mxu1 %v2440_v17  ;;  %2012 = vmatprep.mubr.msk.f32.mxu1 %vm2441_vm1, %v2442_v21 }
  0x88   : > { %609 = vadd.xlane.f32.xlu0 %v608_v2  ;;  %v2108_v16 = vpack.c.bf16 %v654_v15, %v653_v14  ;;  %v655_v18 = vld [vmem:[%s2966_s2 + $0x10] sm:$0xff]  ;;  %v656_v19 = vld [vmem:[%s2966_s2 + $0x18] sm:$0xff]  ;;  %2026 = vmatprep.subr.mxu0 %v2442_v21  ;;  %v1929_v29 = vld [vmem:[%s2976_s12] ss:$0 sm:$0xff]  ;;  %s2443_s9 = smov 120   ;;  %vm836_vm2 = vcmask 64512  }
  0x89   : > { %v2111_v20 = vpack.c.bf16 %v656_v19, %v655_v18  ;;  %2028 = vmatprep.mubr.msk.f32.mxu0 %vm2441_vm1, %v2442_v21  ;;  %v737_v31 = vld [vmem:[%s2968_s4] sm:$0xff]  ;;  %v738_v32 = vld [vmem:[%s2968_s4 + $0x8] sm:$0xff]  ;;  %v739_v39 = vld [vmem:[%s2968_s4 + $0x10] sm:$0xff]  ;;  %s2444_s15 = smov 112   ;;  %s2445_s20 = smov 104   ;;  %vm1494_vm3 = vcmask 130048  }
  0x8a   : > { %2109 = vmatpush3.bf16.msra.mxu1 %v2108_v16  ;;  %v1930_v33 = vld [vmem:[%s2977_s13] ss:$0 sm:$0xff]  ;;  %v2114_v36 = vpack.c.bf16 %v738_v32, %v737_v31  ;;  %v740_v40 = vld [vmem:[%s2968_s4 + $0x18] sm:$0xff]  ;;  %s2446_s17 = smov 96   ;;  %s2447_s19 = smov 8   ;;  %vm1496_vm4 = vcmask 195584  }
  0x8b   : > { %2110 = vmatprep.subr.bf16.mxu1 %v2440_v17  ;;  %v2117_v41 = vpack.c.bf16 %v740_v40, %v739_v39  ;;  %v1931_v44 = vld [vmem:[%s2967_s3] ss:$0 sm:$0xff]  ;;  %s2448_s14 = smov 16   ;;  %s2449_s18 = smov 24   ;;  %vm1712_vm5 = vcmask 523264  }
  0x8c   : > { %639 = vadd.xlane.f32.xlu0 %v638_v3  ;;  %v1933_v49 = vld [vmem:[%s2969_s5] ss:$0 sm:$0xff]  ;;  %s3029_s27 = sld [smem:[#allocation23_spill]]  ;;  %s3030_s29 = sld [smem:[#allocation19_spill]] }
  0x8d   : > { %s604_s24 = scalar_lea.vmem [#allocation8], %s2715_s23  ;;  %s3032_s30 = sld [smem:[#allocation28_spill]] }
  0x8e   : > { %2112 = vmatpush3.bf16.msra.mxu1 %v2111_v20  ;;  %s1803_s10 = sshll.u32 %s604_s24, 4  ;;  %s1789_s0 = scalar_lea.sflag [#allocation4], %s2712_s21  ;;  %s2916_s10 = int_to_ptr.vmem [resolvable:$true] %s1803_s10 }
  0x8f   : > { %2113 = vmatprep.subr.bf16.mxu1 %v2440_v17  ;;  %s2343_s28 = scalar_lea.vmem %s2916_s10, 128  ;;  %s2450_s23 = smov [#allocation8]  }
  0x90   : > { %p2344_p12 = scmp.ne.s32.totalorder %s2916_s10, %s2343_s28 }
  0x92   : > { %p3033_p0 = scmp.ne.s32.totalorder %s3030_s29, 0 }
  0x94   : > { %p2345_p5 = pnand %p2344_p12, %p3033_p0 }
  0x96   : > { %p2346_p9 = pneg %p2345_p5 }
 0x115   : > { %v610_v4 = vpop.xlane.xlu0 %609 }
 0x116   : > { %v612_v5 = vmul.f32 0.03125, %v610_v4 }
 0x118   : > { %v613_v6 = vsub.f32 %v2733_v0, %v612_v5 }
 0x119   : > { %v640_v7 = vpop.xlane.xlu0 %639 }
 0x11a   : > { %v641_v8 = vmul.f32 0.03125, %v640_v7  ;;  %v614_v9 = vmul.f32 %v613_v6, %v613_v6 }
 0x11c   : > { %v642_v10 = vsub.f32 %v605_v1, %v641_v8  ;;  %v615_v11 = vsel %vm607_vm0, %v614_v9, 0.0 }
 0x11d   : > { %616 = vadd.xlane.f32.xlu1 %v615_v11 }
 0x11e   : > { %v643_v12 = vmul.f32 %v642_v10, %v642_v10 }
 0x120   : > { %v644_v13 = vsel %vm607_vm0, %v643_v12, 0.0 }
 0x121   : > { %645 = vadd.xlane.f32.xlu1 %v644_v13 }
 0x1aa   : > { %v617_v22 = vpop.xlane.xlu1 %616 }
 0x1ab   : > { %v618_v23 = vmul.f32 0.03125, %v617_v22 }
 0x1ad   : > { %v619_v24 = vadd.f32 1e-05, %v618_v23 }
 0x1ae   : > { %v646_v25 = vpop.xlane.xlu1 %645 }
 0x1af   : > { %2233 = vrsqrt.f32 %v619_v24  ;;  %v647_v26 = vmul.f32 0.03125, %v646_v25 }
 0x1b1   : > { %v648_v27 = vadd.f32 1e-05, %v647_v26 }
 0x1b3   : > { %2235 = vrsqrt.f32 %v648_v27 }
 0x1b9   : > { %v2234_v28 = vpop.eup %2233 }
 0x1ba   : > { %v621_v30 = vmul.f32 %v2234_v28, %v613_v6 }
 0x1bc   : > { %v629_v34 = vmul.f32 %v1929_v29, %v621_v30 }
 0x1bd   : > { %v2236_v35 = vpop.eup %2235 }
 0x1be   : > { %v650_v37 = vmul.f32 %v2236_v35, %v642_v10  ;;  %v637_v38 = vadd.f32 %v1930_v33, %v629_v34 }
 0x1c0   : > { %2013 = vmatmul.mubr.msk.f32.vlgmr.msra.gmra.mrb[0].mxu1 %vm607_vm0, %v637_v38  ;;  %v651_v42 = vmul.f32 %v1929_v29, %v650_v37 }
 0x1c1   : > { %2115 = vmatpush3.bf16.msra.mxu1 %v2114_v36  ;;  %2023 = vmatprep.mubr.msk.f32.mxu1 %vm2441_vm1, %v2442_v21 }
 0x1c2   : > { %2116 = vmatprep.subr.bf16.mxu1 %v2440_v17  ;;  %v652_v43 = vadd.f32 %v1930_v33, %v651_v42 }
 0x1c5   : > { %2118 = vmatpush3.bf16.msra.mxu1 %v2117_v41 }
 0x1c6   : > { %2031 = vmatprep.subr.mxu1 %v2442_v21 }
 0x1c8   : > { %2024 = vmatmul.mubr.msk.f32.vlgmr.msra.gmra.mrb[2].mxu1 %vm607_vm0, %v652_v43 }
 0x1c9   : > { %2033 = vmatprep.mubr.msk.f32.mxu1 %vm2441_vm1, %v2442_v21 }
 0x293   : > { %v733_v45 = vpop.f32.mrb[0].mxu1 }
 0x294   : > { %v734_v46 = vadd.f32 %v1931_v44, %v733_v45  ;;  %v2014_v47 = vpop.f32.mrb[1].mxu1 }
 0x295   : > { %v1499_v47 = vld [vmem:[%s2970_s6 + $0x8] sm:$0xff] }
 0x296   : > { %v821_v48 = vmul.f32 0.35355338, %v734_v46  ;;  %v1498_v46 = vld [vmem:[%s2970_s6] sm:$0xff] }
 0x298   : > { %823 = vrot.lane.b32.xlu1 %v821_v48, %s2443_s9 }
 0x29b   : > { %v817_v50 = vpop.f32.mrb[2].mxu1 }
 0x29c   : > { %v2793_v51 = vadd.f32 %v1933_v49, %v817_v50  ;;  %v2025_v52 = vpop.f32.mrb[3].mxu1  ;;  %v2120_v49 = vpack.c.bf16 %v1499_v47, %v1498_v46  ;;  %v1501_v50 = vld [vmem:[%s2970_s6 + $0x18] sm:$0xff] }
 0x29e   : > { %832 = vrot.lane.b32.xlu1 %v2793_v51, %s2444_s15  ;;  %830 = vrot.lane.b32.xlu0 %v2793_v51, %s2443_s9  ;;  %s3026_s9 = sld [smem:[#allocation26_spill]] }
 0x29f   : > { %2027 = vmatpush3.xpose.msk.msra.mxu0 %vm836_vm2, %v2793_v51 }
 0x2a0   : > { %2036 = vmatprep.subr.mxu0 %v2442_v21 }
 0x2a2   : > { %2029 = vmatmul.mubr.msk.f32.vlgmr.msra.gmra.mrb[0].mxu0 %vm836_vm2, %v821_v48  ;;  %834 = vrot.lane.b32.xlu1 %v2793_v51, %s2445_s20 }
 0x2a3   : > { %825 = vrot.lane.b32.xlu0 %v821_v48, %s2444_s15  ;;  %2038 = vmatprep.mubr.msk.f32.mxu0 %vm2441_vm1, %v2442_v21  ;;  %s3027_s15 = sld [smem:[#allocation27_spill]] }
 0x2a6   : > { %827 = vrot.lane.b32.xlu1 %v821_v48, %s2445_s20  ;;  %v1500_v48 = vld [vmem:[%s2970_s6 + $0x10] sm:$0xff]  ;;  %s3025_s20 = sld [smem:[#allocation24_spill]] }
 0x30a   : > { %v824_v53 = vpop.permute.xlu1 %823 }
 0x310   : > { %v831_v54 = vpop.permute.xlu0 %830  ;;  %v833_v55 = vpop.permute.xlu1 %832 }
 0x311   : > { %2032 = vmatpush3.xpose.msk.msra.mxu1 %vm836_vm2, %v831_v54  ;;  %2037 = vmatpush3.xpose.msk.msra.mxu0 %vm836_vm2, %v833_v55 }
 0x312   : > { %2041 = vmatprep.subr.mxu1 %v2442_v21  ;;  %2046 = vmatprep.subr.mxu0 %v2442_v21 }
 0x314   : > { %2034 = vmatmul.mubr.msk.f32.vlgmr.msra.gmra.mrb[4].mxu1 %vm836_vm2, %v824_v53  ;;  %v835_v56 = vpop.permute.xlu1 %834 }
 0x315   : > { %v826_v57 = vpop.permute.xlu0 %825  ;;  %2042 = vmatpush3.xpose.msk.msra.mxu1 %vm836_vm2, %v835_v56  ;;  %2043 = vmatprep.mubr.msk.f32.mxu1 %vm2441_vm1, %v2442_v21 }
 0x316   : > { %2039 = vmatmul.mubr.msk.f32.vlgmr.msra.gmra.mrb[2].mxu0 %vm836_vm2, %v826_v57  ;;  %2051 = vmatprep.subr.mxu1 %v2442_v21 }
 0x317   : > { %2048 = vmatprep.mubr.msk.f32.mxu0 %vm2441_vm1, %v2442_v21 }
 0x318   : > { %v828_v58 = vpop.permute.xlu1 %827 }
 0x319   : > { %2044 = vmatmul.mubr.msk.f32.vlgmr.msra.gmra.mrb[6].mxu1 %vm836_vm2, %v828_v58 }
 0x31a   : > { %2053 = vmatprep.mubr.msk.f32.mxu1 %vm2441_vm1, %v2442_v21 }
 0x375   : > { %v907_v59 = vpop.f32.mrb[0].mxu0 }
 0x376   : > { %v2030_v60 = vpop.f32.mrb[1].mxu0  ;;  %v1133_v61 = vsel %vm836_vm2, %v907_v59, -inf }
 0x377   : > { %1134 = vmax.xlane.f32.xlu0 %v1133_v61 }
 0x3e7   : > { %v981_v62 = vpop.f32.mrb[4].mxu1 }
 0x3e8   : > { %v2035_v63 = vpop.f32.mrb[5].mxu1  ;;  %v1136_v1 = vsel %vm836_vm2, %v981_v62, -inf }
 0x3e9   : > { %v1055_v2 = vpop.f32.mrb[2].mxu0  ;;  %1137 = vmax.xlane.f32.xlu1 %v1136_v1 }
 0x3ea   : > { %v2040_v3 = vpop.f32.mrb[3].mxu0  ;;  %v1139_v4 = vsel %vm836_vm2, %v1055_v2, -inf }
 0x3eb   : > { %1140 = vmax.xlane.f32.xlu0 %v1139_v4  ;;  %v1947_v3 = vld [vmem:[%s2971_s7] ss:$0 sm:$0xff] }
 0x3ec   : > { %v1129_v5 = vpop.f32.mrb[6].mxu1 }
 0x3ed   : > { %v2045_v6 = vpop.f32.mrb[7].mxu1  ;;  %v1142_v7 = vsel %vm836_vm2, %v1129_v5, -inf }
 0x3ef   : > { %1143 = vmax.xlane.f32.xlu0 %v1142_v7 }
 0x404   : > { %v1135_v8 = vpop.xlane.xlu0 %1134 }
 0x405   : > { %v1145_v9 = vsub.f32 %v907_v59, %v1135_v8 }
 0x407   : > { %v1149_v10 = vmul.f32 1.442695, %v1145_v9 }
 0x409   : > { %2237 = vpow2.f32 %v1149_v10 }
 0x413   : > { %v2238_v11 = vpop.eup %2237 }
 0x414   : > { %v1157_v12 = vsel %vm836_vm2, %v2238_v11, 0.0 }
 0x415   : > { %1158 = vadd.xlane.f32.xlu0 %v1157_v12 }
 0x476   : > { %v1138_v13 = vpop.xlane.xlu1 %1137 }
 0x477   : > { %v1146_v14 = vsub.f32 %v981_v62, %v1138_v13 }
 0x478   : > { %v1141_v15 = vpop.xlane.xlu0 %1140 }
 0x479   : > { %v1151_v16 = vmul.f32 1.442695, %v1146_v14  ;;  %v1147_v18 = vsub.f32 %v1055_v2, %v1141_v15  ;;  %v1613_v14 = vld [vmem:[#allocation7 + $0x8] sm:$0xff] }
 0x47b   : > { %2239 = vpow2.f32 %v1151_v16  ;;  %v1153_v19 = vmul.f32 1.442695, %v1147_v18  ;;  %v1614_v16 = vld [vmem:[#allocation7 + $0x10] sm:$0xff]  ;;  %v1615_v18 = vld [vmem:[#allocation7 + $0x18] sm:$0xff] }
 0x47c   : > { %v1144_v25 = vpop.xlane.xlu0 %1143 }
 0x47d   : > { %2241 = vpow2.f32 %v1153_v19  ;;  %v1148_v26 = vsub.f32 %v1129_v5, %v1144_v25  ;;  %v2129_v19 = vpack.c.bf16 %v1615_v18, %v1614_v16 }
 0x47f   : > { %v1155_v27 = vmul.f32 1.442695, %v1148_v26  ;;  %v1701_v26 = vld [vmem:[%s3025_s20 + $0x20] sm:$0xff] }
 0x481   : > { %2243 = vpow2.f32 %v1155_v27  ;;  %v1702_v27 = vld [vmem:[%s3025_s20 + $0x28] sm:$0xff] }
 0x485   : > { %v2240_v20 = vpop.eup %2239 }
 0x486   : > { %v1160_v22 = vsel %vm836_vm2, %v2240_v20, 0.0 }
 0x487   : > { %v2242_v23 = vpop.eup %2241  ;;  %1161 = vadd.xlane.f32.xlu1 %v1160_v22  ;;  %v1699_v22 = vld [vmem:[%s3025_s20 + $0x10] sm:$0xff] }
 0x488   : > { %v1163_v24 = vsel %vm836_vm2, %v2242_v23, 0.0 }
 0x489   : > { %1164 = vadd.xlane.f32.xlu0 %v1163_v24  ;;  %v1700_v24 = vld [vmem:[%s3025_s20 + $0x18] sm:$0xff] }
 0x48a   : > { %v2135_v25 = vpack.c.bf16 %v1700_v24, %v1699_v22 }
 0x48b   : > { %v2244_v28 = vpop.eup %2243 }
 0x48c   : > { %v1166_v29 = vsel %vm836_vm2, %v2244_v28, 0.0 }
 0x498   : > { %1253 = vrot.lane.b32.xlu1 %v831_v54, %s2446_s17 }
 0x49c   : > { %1329 = vrot.lane.b32.xlu1 %v833_v55, %s2446_s17 }
 0x49f   : > { %1177 = vrot.lane.b32.xlu0 %v2793_v51, %s2446_s17  ;;  %v2123_v51 = vpack.c.bf16 %v1501_v50, %v1500_v48 }
 0x4a2   : > { %v1159_v30 = vpop.xlane.xlu0 %1158 }
 0x4a3   : > { %2245 = vrcp.f32 %v1159_v30 }
 0x4ad   : > { %v2246_v33 = vpop.eup %2245 }
 0x4ae   : > { %v1173_v35 = vmul.f32 %v2246_v33, %v2238_v11  ;;  %v1949_v33 = vld [vmem:[%s3026_s9] ss:$0 sm:$0xff] }
 0x4c0   : > { %1167 = vadd.xlane.f32.xlu1 %v1166_v29 }
 0x4d1   : > { %1405 = vrot.lane.b32.xlu1 %v835_v56, %s2446_s17  ;;  %s3028_s17 = sld [smem:[#allocation15_spill]] }
 0x4d7   : > { %s1956_s9 = sshll.u32 %s3028_s17, 7  ;;  %s2347_s17 = sshll.u32 %s2450_s23, 4  ;;  %s2348_s17 = int_to_ptr.vmem [resolvable:$false] %s2347_s17 }
 0x4d8   : > { %s2914_s25 = scalar_lea.hbm %s3032_s30, %s1956_s9  ;;  %s2349_s16 = scalar_lea.vmem %s2348_s17, 256 }
 0x4d9   : > { %p2350_p1 = scmp.lt.s32.totalorder %s2916_s10, %s2348_s17  ;;  %p2351_p2 = scmp.lt.s32.totalorder %s2349_s16, %s2343_s28 }
 0x4db   : > { %p2352_p7 = por %p2351_p2, %p2350_p1 }
 0x4dd   : > { %p2353_p4 = pnand %p2352_p7, %p2346_p9 }
 0x514   : > { %v1162_v31 = vpop.xlane.xlu1 %1161 }
 0x515   : > { %2247 = vrcp.f32 %v1162_v31 }
 0x516   : > { %v1165_v32 = vpop.xlane.xlu0 %1164 }
 0x517   : > { %2249 = vrcp.f32 %v1165_v32 }
 0x518   : > { %v1254_v34 = vpop.permute.xlu1 %1253 }
 0x519   : > { %2052 = vmatpush3.msra.mxu1 %v1254_v34 }
 0x51a   : > { %v1178_v36 = vpop.permute.xlu0 %1177  ;;  %2061 = vmatprep.subr.mxu1 %v2442_v21 }
 0x51b   : > { %2047 = vmatpush3.msra.mxu0 %v1178_v36 }
 0x51c   : > { %2049 = vmatmul.mubr.msk.f32.vlgmr.msra.gmra.mrb[4].mxu0 %vm836_vm2, %v1173_v35  ;;  %2056 = vmatprep.subr.mxu0 %v2442_v21  ;;  %v1330_v37 = vpop.permute.xlu1 %1329  ;;  %v1950_v35 = vld [vmem:[%s3027_s15] ss:$0 sm:$0xff] }
 0x51d   : > { %2057 = vmatpush3.msra.mxu0 %v1330_v37  ;;  %2058 = vmatprep.mubr.msk.f32.mxu0 %vm2441_vm1, %v2442_v21 }
 0x51e   : > { %2119 = vmatprep.subr.bf16.mxu0 %v2440_v17 }
 0x51f   : > { %v2248_v38 = vpop.eup %2247 }
 0x520   : > { %v1174_v39 = vmul.f32 %v2248_v38, %v2240_v20  ;;  %v1698_v20 = vld [vmem:[%s3025_s20 + $0x8] sm:$0xff]  ;;  %v1704_v38 = vld [vmem:[%s3025_s20 + $0x38] sm:$0xff] }
 0x521   : > { %v2250_v40 = vpop.eup %2249 }
 0x522   : > { %v1175_v41 = vmul.f32 %v2250_v40, %v2242_v23  ;;  %2054 = vmatmul.mubr.msk.f32.vlgmr.msra.gmra.mrb[8].mxu1 %vm836_vm2, %v1174_v39  ;;  %v1951_v40 = vld [vmem:[%s3029_s27] ss:$0 sm:$0xff] }
 0x523   : > { %2063 = vmatprep.mubr.msk.f32.mxu1 %vm2441_vm1, %v2442_v21 }
 0x524   : > { %2059 = vmatmul.mubr.msk.f32.vlgmr.msra.gmra.mrb[6].mxu0 %vm836_vm2, %v1175_v41 }
 0x525   : > { %2074 = vmatprep.mubr.msk.f32.mxu0 %vm2441_vm1, %v2442_v21  ;;  %2121 = vmatpush3.bf16.msra.mxu0 %v2120_v49 }
 0x526   : > { %2122 = vmatprep.subr.bf16.mxu0 %v2440_v17 }
 0x529   : > { %2124 = vmatpush3.bf16.msra.mxu0 %v2123_v51 }
 0x52a   : > { %2131 = vmatprep.subr.bf16.mxu0 %v2440_v17 }
 0x54d   : > { %v1168_v42 = vpop.xlane.xlu1 %1167 }
 0x54e   : > { %2251 = vrcp.f32 %v1168_v42 }
 0x551   : > { %v1406_v43 = vpop.permute.xlu1 %1405 }
 0x552   : > { %2062 = vmatpush3.msra.mxu1 %v1406_v43 }
 0x553   : > { %2125 = vmatprep.subr.bf16.mxu1 %v2440_v17 }
 0x558   : > { %v2252_v44 = vpop.eup %2251 }
 0x559   : > { %v1176_v45 = vmul.f32 %v2252_v44, %v2244_v28  ;;  %v2138_v28 = vpack.c.bf16 %v1702_v27, %v1701_v26 }
 0x55b   : > { %2064 = vmatmul.mubr.msk.f32.vlgmr.msra.gmra.mrb[10].mxu1 %vm836_vm2, %v1176_v45 }
 0x55c   : > { %2085 = vmatprep.mubr.msk.f32.mxu1 %vm2441_vm1, %v2442_v21 }
 0x5ef   : > { %v1249_v52 = vpop.f32.mrb[4].mxu0 }
 0x5f0   : > { %v2050_v53 = vpop.f32.mrb[5].mxu0 }
 0x5f5   : > { %v1325_v54 = vpop.f32.mrb[8].mxu1 }
 0x5f6   : > { %1482 = vrot.lane.b32.xlu0 %v1325_v54, %s2447_s19  ;;  %v2055_v55 = vpop.f32.mrb[9].mxu1 }
 0x5f7   : > { %v1401_v56 = vpop.f32.mrb[6].mxu0 }
 0x5f8   : > { %1486 = vrot.lane.b32.xlu1 %v1401_v56, %s2448_s14  ;;  %v2060_v57 = vpop.f32.mrb[7].mxu0 }
 0x62e   : > { %v1477_v58 = vpop.f32.mrb[10].mxu1 }
 0x62f   : > { %1490 = vrot.lane.b32.xlu0 %v1477_v58, %s2449_s18  ;;  %v2065_v59 = vpop.f32.mrb[11].mxu1  ;;  %s3031_s18 = sld [smem:[#allocation25_spill]] }
 0x635   : > { %v1953_v45 = vld [vmem:[%s3031_s18] ss:$0 sm:$0xff] }
 0x668   : > { %v1483_v60 = vpop.permute.xlu0 %1482 }
 0x669   : > { %v1493_v61 = vsel %vm836_vm2, %v1249_v52, %v1483_v60 }
 0x66a   : > { %v1487_v62 = vpop.permute.xlu1 %1486 }
 0x66b   : > { %v1495_v63 = vsel %vm1494_vm3, %v1493_v61, %v1487_v62 }
 0x6a1   : > { %v1491_v1 = vpop.permute.xlu0 %1490 }
 0x6a2   : > { %v1497_v2 = vsel %vm1496_vm4, %v1495_v63, %v1491_v1 }
 0x6a3   : > { %2075 = vmatmul.mubr.msk.f32.vlgmr.msra.gmra.mrb[8].mxu0 %vm607_vm0, %v1497_v2 }
 0x6a4   : > { %2104 = vmatprep.mubr.msk.f32.mxu0 %vm2441_vm1, %v2442_v21  ;;  %v1612_v21 = vld [vmem:[#allocation7] sm:$0xff] }
 0x6a5   : > { %v2126_v15 = vpack.c.bf16 %v1613_v14, %v1612_v21 }
 0x6a7   : > { %2127 = vmatpush3.bf16.msra.mxu1 %v2126_v15 }
 0x6a8   : > { %2128 = vmatprep.subr.bf16.mxu1 %v2440_v17 }
 0x6ab   : > { %2130 = vmatpush3.bf16.msra.mxu1 %v2129_v19 }
 0x776   : > { %v1578_v4 = vpop.f32.mrb[8].mxu0 }
 0x777   : > { %v1579_v5 = vadd.f32 %v1947_v3, %v1578_v4  ;;  %v2076_v6 = vpop.f32.mrb[9].mxu0 }
 0x779   : > { %v1582_v7 = vadd.f32 %v1579_v5, %v2733_v0  ;;  %v1697_v0 = vld [vmem:[%s3025_s20] sm:$0xff] }
 0x77a   : > { %v2132_v23 = vpack.c.bf16 %v1698_v20, %v1697_v0 }
 0x77b   : > { %v1583_v8 = vsel %vm607_vm0, %v1582_v7, 0.0 }
 0x77c   : > { %1584 = vadd.xlane.f32.xlu1 %v1583_v8  ;;  %2133 = vmatpush3.bf16.msra.mxu0 %v2132_v23 }
 0x77d   : > { %2134 = vmatprep.subr.bf16.mxu0 %v2440_v17 }
 0x780   : > { %2136 = vmatpush3.bf16.msra.mxu0 %v2135_v25 }
 0x781   : > { %2137 = vmatprep.subr.bf16.mxu0 %v2440_v17 }
 0x784   : > { %2139 = vmatpush3.bf16.msra.mxu0 %v2138_v28 }
 0x785   : > { %2140 = vmatprep.subr.bf16.mxu0 %v2440_v17  ;;  %v1703_v17 = vld [vmem:[%s3025_s20 + $0x30] sm:$0xff] }
 0x786   : > { %v2141_v39 = vpack.c.bf16 %v1704_v38, %v1703_v17 }
 0x788   : > { %2142 = vmatpush3.bf16.msra.mxu0 %v2141_v39 }
 0x809   : > { %v1585_v9 = vpop.xlane.xlu1 %1584 }
 0x80a   : > { %v1586_v10 = vmul.f32 0.03125, %v1585_v9 }
 0x80c   : > { %v1587_v11 = vsub.f32 %v1582_v7, %v1586_v10 }
 0x80e   : > { %v1588_v12 = vmul.f32 %v1587_v11, %v1587_v11 }
 0x810   : > { %v1589_v13 = vsel %vm607_vm0, %v1588_v12, 0.0 }
 0x811   : > { %1590 = vadd.xlane.f32.xlu0 %v1589_v13 }
 0x89e   : > { %v1591_v29 = vpop.xlane.xlu0 %1590 }
 0x89f   : > { %v1592_v30 = vmul.f32 0.03125, %v1591_v29 }
 0x8a1   : > { %v1593_v31 = vadd.f32 1e-05, %v1592_v30 }
 0x8a3   : > { %2253 = vrsqrt.f32 %v1593_v31 }
 0x8ad   : > { %v2254_v32 = vpop.eup %2253 }
 0x8ae   : > { %v1595_v34 = vmul.f32 %v2254_v32, %v1587_v11 }
 0x8b0   : > { %v1603_v36 = vmul.f32 %v1949_v33, %v1595_v34 }
 0x8b2   : > { %v1611_v37 = vadd.f32 %v1950_v35, %v1603_v36 }
 0x8b4   : > { %2086 = vmatmul.mubr.msk.f32.vlgmr.msra.gmra.mrb[12].mxu1 %vm607_vm0, %v1611_v37 }
 0x987   : > { %v1692_v41 = vpop.f32.mrb[12].mxu1 }
 0x988   : > { %v1693_v42 = vadd.f32 %v1951_v40, %v1692_v41  ;;  %v2087_v43 = vpop.f32.mrb[13].mxu1 }
 0x98a   : > { %v1696_v44 = vmax.f32 %v1693_v42, 0.0 }
 0x98c   : > { %2105 = vmatmul.mubr.msk.f32.vlgmr.msra.gmra.mrb[10].mxu0 %vm1712_vm5, %v1696_v44 }
 0xa5f   : > { %v1782_v46 = vpop.f32.mrb[10].mxu0 }
 0xa60   : > { %v1783_v47 = vadd.f32 %v1953_v45, %v1782_v46  ;;  %v2106_v48 = vpop.f32.mrb[11].mxu0 }
 0xa62   : > { %v1786_v49 = vadd.f32 %v1783_v47, %v1582_v7 }
 0xa64   : > { %1787 = vst.msk [vmem:[%s604_s24] sm:$0xff] %vm607_vm0, %v1786_v49 }
 0xa65   : > { %2356 = shalt.err (!%p2353_p4)
}
 0xa66   : > { %s2357_s21 = scalar_lea.hbm %s2914_s25, 128  ;;  %s2361_s14 = scalar_lea.hbm %s3032_s30, 256 }
 0xa67   : > { %p2358_p8 = scmp.ne.s32.totalorder %s2914_s25, %s2357_s21  ;;  %p2362_p10 = scmp.lt.u32.totalorder %s2914_s25, %s3032_s30 }
 0xa68   : > { %p2363_p13 = scmp.lt.u32.totalorder %s2361_s14, %s2357_s21  ;;  %p2365_p12 = scmp.lt.u32.totalorder %s2357_s21, %s2914_s25 }
 0xa69   : > { %p2359_p11 = pnand %p2358_p8, %p3033_p0 }
 0xa6a   : > { %p2364_p3 = por %p2363_p13, %p2362_p10 }
 0xa6b   : > { %p2360_p6 = pneg %p2359_p11 }
 0xa6c   : > { %p2366_p5 = por %p2365_p12, %p2364_p3 }
 0xa6e   : > { %p2367_p9 = pnand %p2366_p5, %p2360_p6 }
 0xa70   : > { %2370 = shalt.err (!%p2367_p9)
}
 0xa71   : > { %2151 = dma.vmem_to_hbm [thread:$0]  (%p3033_p0), %s2916_s10, 128, %s2914_s25, %s1789_s0  }
 0xa72 PF: > { %s3034_s24 = sld [smem:[#allocation13_spill]]  ;;  %s3035_s15 = sld [smem:[#allocation17_spill]] }
 0xa73   : > { %p3037_p2 = scmp.ge.s32.totalorder %s2433_s26, 2 }
 0xa78   : > { %s1815_s11 = sand.u32 1, %s3034_s24   ;;  %p3036_p1 = scmp.ne.s32.totalorder %s3035_s15, 0 }
 0xa79   : > { %s1816_s28 = scalar_lea.sflag [#allocation4], %s1815_s11 }
 0xa7a   : > { %p2165_p7 = pnand %p3037_p2, %p3036_p1 }
 0xa7c   : > { %2408 = dma.done.wait (!%p2165_p7), %s1816_s28, 128  }
 0xa7d   : > { %2410 = vsyncadd (!%p2165_p7), %s1816_s28, 4294967168  ;;  %s35_s26 = sadd.s32 1, %s2433_s26   ;;  %s3038_s23 = sld [smem:[#allocation14_spill]] }
 0xa7e   : > { %p32_p4 = scmp.ge.s32.totalorder %s35_s26, 4   ;;  %s3039_s29 = sld [smem:[#allocation20_spill]] }
 0xa7f   : > { %s3040_s24 = sld [smem:[#allocation16_spill]]  ;;  %s3041_s25 = sld [smem:[#allocation18_spill]] }
 0xa80   : > { %s3042_s21 = smov %s2417_s22  ;;  %34 = sbr.rel (!%p32_p4) target bundleno = 17 (0x11), region = 146 }
 0xa83   : > { %s3043_s22 = smov %s3038_s23 }
 0xa84   : > { %s3044_s23 = smov %s3039_s29 }
 0xa87   :  { %1821 = vsyncpa [#allocation3], 1 }
 0xa88   :  { %1823 = vsyncpa [#allocation3 + $0x1], 1 }
 0xa89   :  { %1824 = vsyncpa [#allocation6], 1 }
 0xa8a   :  { %1826 = vsyncpa [#allocation6 + $0x1], 1 }
 0xa8b   :  { %1827 = vsyncpa [#allocation4], 1 }
 0xa8c   :  { %1829 = vsyncpa [#allocation4 + $0x1], 1 }

</bundles_post_ra>
